<compile_context>
chip_gen: v5e
topology: v5e:2x2
jax: 0.10.0
libtpu: 0.0.40
codegen_flags: <defaults>
</compile_context>

<pallas_src>
import jax
import jax.numpy as jnp
from jax import lax
from jax.experimental import pallas as pl
from jax.experimental.pallas import tpu as pltpu


def _inverse_gasf_kernel(smin_ref, smax_ref, g_ref, out_ref):
    # g_ref  : (Bb, TB, TB)  -- channel dim squeezed away by the BlockSpec
    # out_ref: (Bb, TB)
    bb, tb = out_ref.shape
    g = g_ref[...]

    # Diagonal extraction via masked lane reduction: diag[r, j] = g[r, j, j].
    row = lax.broadcasted_iota(jnp.int32, (tb, tb), 0)
    col = lax.broadcasted_iota(jnp.int32, (tb, tb), 1)
    diag_mask = (row == col)[None, :, :]
    diag = jnp.sum(jnp.where(diag_mask, g, jnp.zeros_like(g)), axis=-1)  # (Bb, TB)

    # clamp applied only to the diagonal (elementwise clip commutes with
    # diagonal extraction; off-diagonal values were zeroed by the mask).
    diag = jnp.clip(diag, -1.0, 1.0).astype(jnp.float32)
    x = jnp.sqrt((diag + 1.0 + 1e-5) * 0.5)

    # Build (Bb, 1) per-row scale columns from the SMEM-prefetched scalars.
    b0 = pl.program_id(0) * bb
    rid = lax.broadcasted_iota(jnp.int32, (bb, 1), 0)
    smin = jnp.zeros((bb, 1), jnp.float32)
    smax = jnp.zeros((bb, 1), jnp.float32)
    for r in range(bb):  # static unroll; bb scalar SMEM reads + cheap selects
        smin = jnp.where(rid == r, smin_ref[b0 + r], smin)
        smax = jnp.where(rid == r, smax_ref[b0 + r], smax)

    out_ref[...] = (x * (smax - smin) + smin).astype(out_ref.dtype)


def inverse_gasf(g, scale_min, scale_max):
    """g: (B, C, N, N); scale_min/scale_max: scalars or (B,) arrays. Returns (B, N) f32."""
    B, C, N, _ = g.shape
    scale_min = jnp.broadcast_to(jnp.asarray(scale_min, jnp.float32).reshape(-1), (B,))
    scale_max = jnp.broadcast_to(jnp.asarray(scale_max, jnp.float32).reshape(-1), (B,))

    # Tile selection: TB x TB diagonal blocks (lane-aligned when N % 128 == 0,
    # otherwise fall back to the full-dim block which is always legal).
    TB = 128 if N % 128 == 0 else N
    # Batch Bb rows per step for dense output stores / overhead amortization.
    Bb = 8 if B % 8 == 0 else (B if B <= 8 else 1)
    # Keep the double-buffered g block comfortably inside VMEM on every gen
    # (incl. v7x's 64 MiB) -- matters only in the TB == N fallback.
    if 2 * Bb * TB * TB * 4 > 8 * 1024 * 1024:
        Bb = 1

    grid = (B // Bb, N // TB)

    grid_spec = pltpu.PrefetchScalarGridSpec(
        num_scalar_prefetch=2,  # scale_min, scale_max -> SMEM
        grid=grid,
        in_specs=[
            # Only the diagonal band of channel 0 is ever DMA'd.
            pl.BlockSpec((Bb, pl.Squeezed(), TB, TB),
                         lambda b, i, smin, smax: (b, 0, i, i)),
        ],
        out_specs=pl.BlockSpec((Bb, TB), lambda b, i, smin, smax: (b, i)),
    )

    return pl.pallas_call(
        _inverse_gasf_kernel,
        out_shape=jax.ShapeDtypeStruct((B, N), jnp.float32),
        grid_spec=grid_spec,
        compiler_params=pltpu.CompilerParams(
            dimension_semantics=("parallel", "parallel")),
    )(scale_min, scale_max, g)


def _reference(g, scale_min, scale_max):
    g = jnp.clip(g.astype(jnp.float32), -1.0, 1.0)
    diag = jnp.diagonal(g[:, 0], axis1=-2, axis2=-1)  # (B, N)
    x = jnp.sqrt((diag + 1.0 + 1e-5) * 0.5)
    return x * (scale_max - scale_min)[:, None] + scale_min[:, None]


if __name__ == "__main__":
    key = jax.random.PRNGKey(0)

    # Small shape matching the module's implied layout (full-dim block path).
    k1, k2, k3, k4 = jax.random.split(key, 4)
    B, C, N = 2, 4, 16
    g = jax.random.uniform(k1, (B, C, N, N), jnp.float32, minval=-1.5, maxval=1.5)
    smin = jax.random.uniform(k2, (B,), jnp.float32, minval=-2.0, maxval=0.0)
    smax = jax.random.uniform(k3, (B,), jnp.float32, minval=1.0, maxval=3.0)

    out = jax.block_until_ready(inverse_gasf(g, smin, smax))
    ref = _reference(g, smin, smax)
    assert out.shape == (B, N)
    assert jnp.allclose(out, ref, atol=1e-5, rtol=1e-5), "mismatch vs reference (small)"

    # Slightly larger case exercising the tiled (Bb=8, TB=128) diagonal-band path.
    k5, k6, k7, _ = jax.random.split(k4, 4)
    B2, C2, N2 = 8, 2, 256
    g2 = jax.random.uniform(k5, (B2, C2, N2, N2), jnp.float32, minval=-1.5, maxval=1.5)
    smin2 = jax.random.uniform(k6, (B2,), jnp.float32, minval=-2.0, maxval=0.0)
    smax2 = jax.random.uniform(k7, (B2,), jnp.float32, minval=1.0, maxval=3.0)

    out2 = jax.block_until_ready(inverse_gasf(g2, smin2, smax2))
    ref2 = _reference(g2, smin2, smax2)
    assert out2.shape == (B2, N2)
    assert jnp.allclose(out2, ref2, atol=1e-5, rtol=1e-5), "mismatch vs reference (tiled)"

    print("KERNEL_OK")
</pallas_src>

<mosaic_0001>
module attributes {stable_mosaic.version = 11 : i64} {
  func.func @_inverse_gasf_kernel(%arg0: i32, %arg1: i32, %arg2: memref<2xf32, #tpu.memory_space<smem>>, %arg3: memref<2xf32, #tpu.memory_space<smem>>, %arg4: memref<2x1x16x16xf32, #tpu.memory_space<vmem>>, %arg5: memref<2x16xf32, #tpu.memory_space<vmem>>) attributes {dimension_semantics = [#tpu.dimension_semantics<parallel>, #tpu.dimension_semantics<parallel>], iteration_bounds = array<i64: 1, 1>, scalar_prefetch = 2 : i64, scratch_operands = 0 : i64, tpu.core_type = #tpu.core_type<tc>, window_params = [{transform_indices = @transform_0, window_bounds = array<i64: 2, 1, 16, 16>}, {transform_indices = @transform_1, window_bounds = array<i64: 2, 16>}]} {
    %c0 = arith.constant 0 : index
    %c0_0 = arith.constant 0 : index
    %c0_1 = arith.constant 0 : index
    %c0_2 = arith.constant 0 : index
    %0 = vector.load %arg4[%c0, %c0_0, %c0_1, %c0_2] : memref<2x1x16x16xf32, #tpu.memory_space<vmem>>, vector<2x1x16x16xf32>
    %1 = vector.shape_cast %0 : vector<2x1x16x16xf32> to vector<2x16x16xf32>
    %2 = tpu.iota {dimensions = array<i32: 0>} : vector<16x16xi32>
    %3 = tpu.iota {dimensions = array<i32: 1>} : vector<16x16xi32>
    %4 = arith.cmpi eq, %2, %3 : vector<16x16xi32>
    %5 = vector.shape_cast %4 : vector<16x16xi1> to vector<1x16x16xi1>
    %cst = arith.constant 0.000000e+00 : f32
    %6 = vector.broadcast %cst : f32 to vector<2x16x16xf32>
    %7 = vector.shape_cast %5 : vector<1x16x16xi1> to vector<1x16x16xi1>
    %8 = vector.broadcast %7 : vector<1x16x16xi1> to vector<2x16x16xi1>
    %9 = arith.select %8, %1, %6 : vector<2x16x16xi1>, vector<2x16x16xf32>
    %cst_3 = arith.constant dense<0.000000e+00> : vector<2x16xf32>
    %10 = vector.multi_reduction <add>, %9, %cst_3 [2] : vector<2x16x16xf32> to vector<2x16xf32>
    %cst_4 = arith.constant -1.000000e+00 : f32
    %cst_5 = arith.constant 1.000000e+00 : f32
    %11 = vector.broadcast %cst_4 : f32 to vector<2x16xf32>
    %12 = arith.maximumf %11, %10 : vector<2x16xf32>
    %13 = vector.broadcast %cst_5 : f32 to vector<2x16xf32>
    %14 = arith.minimumf %13, %12 : vector<2x16xf32>
    %cst_6 = arith.constant 1.000000e+00 : f32
    %15 = vector.broadcast %cst_6 : f32 to vector<2x16xf32>
    %16 = arith.addf %14, %15 : vector<2x16xf32>
    %cst_7 = arith.constant 9.99999974E-6 : f32
    %17 = vector.broadcast %cst_7 : f32 to vector<2x16xf32>
    %18 = arith.addf %16, %17 : vector<2x16xf32>
    %cst_8 = arith.constant 5.000000e-01 : f32
    %19 = vector.broadcast %cst_8 : f32 to vector<2x16xf32>
    %20 = arith.mulf %18, %19 : vector<2x16xf32>
    %21 = math.sqrt %20 : vector<2x16xf32>
    %c2_i32 = arith.constant 2 : i32
    %22 = arith.muli %arg0, %c2_i32 : i32
    %23 = tpu.iota {dimensions = array<i32: 0>} : vector<2x1xi32>
    %cst_9 = arith.constant 0.000000e+00 : f32
    %24 = vector.broadcast %cst_9 : f32 to vector<2x1xf32>
    %cst_10 = arith.constant 0.000000e+00 : f32
    %25 = vector.broadcast %cst_10 : f32 to vector<2x1xf32>
    %c0_i32 = arith.constant 0 : i32
    %26 = vector.broadcast %c0_i32 : i32 to vector<2x1xi32>
    %27 = arith.cmpi eq, %23, %26 : vector<2x1xi32>
    %c0_i32_11 = arith.constant 0 : i32
    %28 = arith.addi %22, %c0_i32_11 : i32
    %29 = arith.index_cast %28 : i32 to index
    %30 = memref.load %arg2[%29] : memref<2xf32, #tpu.memory_space<smem>>
    %31 = vector.broadcast %30 : f32 to vector<2x1xf32>
    %32 = arith.select %27, %31, %24 : vector<2x1xi1>, vector<2x1xf32>
    %c0_i32_12 = arith.constant 0 : i32
    %33 = vector.broadcast %c0_i32_12 : i32 to vector<2x1xi32>
    %34 = arith.cmpi eq, %23, %33 : vector<2x1xi32>
    %c0_i32_13 = arith.constant 0 : i32
    %35 = arith.addi %22, %c0_i32_13 : i32
    %36 = arith.index_cast %35 : i32 to index
    %37 = memref.load %arg3[%36] : memref<2xf32, #tpu.memory_space<smem>>
    %38 = vector.broadcast %37 : f32 to vector<2x1xf32>
    %39 = arith.select %34, %38, %25 : vector<2x1xi1>, vector<2x1xf32>
    %c1_i32 = arith.constant 1 : i32
    %40 = vector.broadcast %c1_i32 : i32 to vector<2x1xi32>
    %41 = arith.cmpi eq, %23, %40 : vector<2x1xi32>
    %c1_i32_14 = arith.constant 1 : i32
    %42 = arith.addi %22, %c1_i32_14 : i32
    %43 = arith.index_cast %42 : i32 to index
    %44 = memref.load %arg2[%43] : memref<2xf32, #tpu.memory_space<smem>>
    %45 = vector.broadcast %44 : f32 to vector<2x1xf32>
    %46 = arith.select %41, %45, %32 : vector<2x1xi1>, vector<2x1xf32>
    %c1_i32_15 = arith.constant 1 : i32
    %47 = vector.broadcast %c1_i32_15 : i32 to vector<2x1xi32>
    %48 = arith.cmpi eq, %23, %47 : vector<2x1xi32>
    %c1_i32_16 = arith.constant 1 : i32
    %49 = arith.addi %22, %c1_i32_16 : i32
    %50 = arith.index_cast %49 : i32 to index
    %51 = memref.load %arg3[%50] : memref<2xf32, #tpu.memory_space<smem>>
    %52 = vector.broadcast %51 : f32 to vector<2x1xf32>
    %53 = arith.select %48, %52, %39 : vector<2x1xi1>, vector<2x1xf32>
    %54 = arith.subf %53, %46 : vector<2x1xf32>
    %55 = vector.broadcast %54 : vector<2x1xf32> to vector<2x16xf32>
    %56 = arith.mulf %21, %55 : vector<2x16xf32>
    %57 = vector.broadcast %46 : vector<2x1xf32> to vector<2x16xf32>
    %58 = arith.addf %56, %57 : vector<2x16xf32>
    %c0_17 = arith.constant 0 : index
    %c0_18 = arith.constant 0 : index
    %59 = vector.load %arg5[%c0_17, %c0_18] : memref<2x16xf32, #tpu.memory_space<vmem>>, vector<2x16xf32>
    tpu.vector_store %arg5[%c0_17, %c0_18], %58 {strides = array<i32>} : memref<2x16xf32, #tpu.memory_space<vmem>>, vector<2x16xf32>,
    return
  }
  func.func @transform_0(%arg0: i32, %arg1: i32, %arg2: memref<2xf32, #tpu.memory_space<smem>>, %arg3: memref<2xf32, #tpu.memory_space<smem>>) -> (i32, i32, i32, i32) {
    %c0_i32 = arith.constant 0 : i32
    %c0_i32_0 = arith.constant 0 : i32
    return %arg0, %c0_i32, %arg1, %arg1 : i32, i32, i32, i32
  }
  func.func @transform_1(%arg0: i32, %arg1: i32, %arg2: memref<2xf32, #tpu.memory_space<smem>>, %arg3: memref<2xf32, #tpu.memory_space<smem>>) -> (i32, i32) {
    %c0_i32 = arith.constant 0 : i32
    return %arg0, %arg1 : i32, i32
  }
}

</mosaic_0001>

<bundles_post_ra>
// kernel: tpu_custom_call.1
= control target key start
LH: loop header
LB: loop body
LE: loop exit
PB: predicated region body
PF: predicated region fallthrough
CT: control target
= control target key end

     0   :  { %s331_s18 = smov [#allocation3]   ;;  %s332_s19 = smov [#allocation4]   ;;  %s420_s0 = inlined_call_operand.hbm [shape: f32[2], index: 0, kind: input, shape index: {}]   ;;  %s421_s2 = inlined_call_operand.hbm [shape: f32[2,4,16,16], index: 2, kind: input, shape index: {}]   ;;  %s422_s3 = inlined_call_operand.hbm [shape: f32[2,16], index: 3, kind: output, shape index: {}]   ;;  %s423_s1 = inlined_call_operand.hbm [shape: f32[2], index: 1, kind: input, shape index: {}]  }
   0x1   :  { %s9_s14 = sshll.u32 %s420_s0, 4  ;;  %s14_s17 = sshll.u32 %s423_s1, 4  ;;  %s10_s14 = int_to_ptr.hbm [resolvable:$true] %s9_s14  ;;  %s15_s17 = int_to_ptr.hbm [resolvable:$true] %s14_s17 }
   0x2   :  { %12 = dma.hbm_to_smem %s10_s14, 16, %s331_s18, [#allocation2] }
   0x3   :  { %17 = dma.hbm_to_smem %s15_s17, 16, %s332_s19, [#allocation2] }
   0x4   :  { %325 = dma.done.wait [#allocation2], 32 }
   0x5   :  { %326 = vsyncadd [#allocation2], 4294967264 }
   0x6   :  { %20 = sfence }
   0x7   :  { %21 = vsyncpa [#allocation6], 0 }
   0x8   :  { %22 = vsyncpa [#allocation7], 0 }
   0x9   :  { %s31_s20 = sld [smem:[#allocation0]]   ;;  %s39_s0 = sshll.u32 %s421_s2, 4  ;;  %s40_s0 = int_to_ptr.hbm [resolvable:$true] %s39_s0 }
   0xa   :  { %s333_s23 = smov [#allocation5]   ;;  %s334_s1 = smov 1024  }
   0xb   :  { %s41_s24 = sshll.u32 %s333_s23, 4  ;;  %48 = sst [smem:[#allocation10]] %s334_s1  ;;  %s42_s24 = int_to_ptr.vmem [resolvable:$true] %s41_s24 }
   0xc   :  { %s335_s25 = smov 256   ;;  %s336_s27 = smov 2  }
   0xd   :  { %50 = sst [smem:[#allocation10 + $0x1]] %s335_s25  ;;  %s337_s29 = smov 128  }
   0xe   :  { %52 = sst [smem:[#allocation10 + $0x2]] %s336_s27  ;;  %s338_s30 = smov 8  }
   0xf   :  { %s246_s26 = sshll.u32 %s31_s20, 26  ;;  %54 = sst [smem:[#allocation10 + $0x3]] %s337_s29 }
  0x10   :  { %s247_s28 = sadd.s32 134217728, %s246_s26  ;;  %56 = sst [smem:[#allocation10 + $0x4]] %s337_s29 }
  0x11   :  { %58 = sst [smem:[#allocation10 + $0x5]] %s338_s30  ;;  %s339_s4 = smov [#allocation6]  }
  0x12   :  { %s340_s5 = smov [#allocation9]  }
  0x13   :  { %60 = dma.general %s40_s0, 512, %s42_s24, %s339_s4, %s340_s5, [#allocation10], %s247_s28, 0  }
  0x14   :  { %327 = dma.done.wait [#allocation6], 512  }
  0x15   :  { %328 = vsyncadd [#allocation6], 4294966784  ;;  %v69_v0 = vlaneseq  ;;  %vm84_vm1 = vcmask 130048   ;;  %v67_v4 = vld [vmem:[#allocation5 + $0x10] sm:$0xff]  ;;  %v65_v5 = vld [vmem:[#allocation5] sm:$0xff]  ;;  %v341_v16 = vmov 0  }
  0x16   :  { %v68_v10 = vld [vmem:[#allocation5 + $0x18] sm:$0xff]  ;;  %v66_v11 = vld [vmem:[#allocation5 + $0x8] sm:$0xff]  ;;  %267 = vset.pattern.permute.xlu0 %v341_v16  ;;  %266 = vset.pattern.permute.xlu2 %v341_v16  ;;  %s167_s2 = sld [smem:[#allocation3]]  ;;  %vm219_vm13 = vcmask 130112   ;;  %s342_s9 = smov [#allocation8]   ;;  %vm224_vm14 = vcmask 1041409  }
  0x17   :  { %v372_v1 = vshrl.u32 %v69_v0, 7  ;;  %v374_v2 = vand.u32 127, %v69_v0  ;;  %268 = vset.pattern.permute.xlu1 %v341_v16  ;;  %s170_s6 = sld [smem:[#allocation4]]  ;;  %s234_s10 = sshll.u32 %s342_s9, 4  ;;  %vm227_vm15 = vcmask 123904   ;;  %s235_s10 = int_to_ptr.vmem [resolvable:$true] %s234_s10 }
  0x18   :  { %s252_s7 = sld [smem:[#allocation3 + $0x1]]  ;;  %s236_s13 = sshll.u32 %s422_s3, 4  ;;  %s237_s13 = int_to_ptr.hbm [resolvable:$true] %s236_s13 }
  0x19   :  { %vm74_vm0 = vcmp.eq.s32.totalorder %v372_v1, %v374_v2  ;;  %v71_v3 = vadd.s32 8, %v372_v1  ;;  %s253_s8 = sld [smem:[#allocation4 + $0x1]]  ;;  %vm166_vm3 = vcmp.eq.s32.totalorder %v372_v1, 0  ;;  %vm173_vm4 = vcmp.eq.s32.totalorder %v372_v1, 1 }
  0x1a   :  { %v82_v6 = vsel %vm74_vm0, %v67_v4, 0.0  ;;  %v80_v7 = vsel %vm74_vm0, %v65_v5, 0.0 }
  0x1b   :  { %v91_v8 = vsel %vm84_vm1, %v82_v6, 0.0  ;;  %v85_v9 = vsel %vm84_vm1, %v80_v7, 0.0  ;;  %vm75_vm2 = vcmp.eq.s32.totalorder %v71_v3, %v374_v2 }
  0x1c   :  { %92 = vadd.xlane.f32.xlu1 %v91_v8  ;;  %86 = vadd.xlane.f32.xlu0 %v85_v9  ;;  %v83_v12 = vsel %vm75_vm2, %v68_v10, 0.0  ;;  %v81_v13 = vsel %vm75_vm2, %v66_v11, 0.0  ;;  %v168_v31 = vstv %s167_s2 }
  0x1d   :  { %v94_v14 = vsel %vm84_vm1, %v83_v12, 0.0  ;;  %v88_v15 = vsel %vm84_vm1, %v81_v13, 0.0  ;;  %v171_v34 = vstv %s170_s6  ;;  %v169_v37 = vsel %vm166_vm3, %v168_v31, 0.0 }
  0x1e   :  { %v172_v38 = vsel %vm166_vm3, %v171_v34, 0.0  ;;  %v176_v39 = vstv %s252_s7 }
  0x1f   :  { %v179_v40 = vstv %s253_s8  ;;  %v390_v46 = vsel %vm173_vm4, %v176_v39, %v169_v37 }
  0x20   :  { %v180_v47 = vsel %vm173_vm4, %v179_v40, %v172_v38  ;;  %v193_v8 = vperm.slane %v390_v46, 1  ;;  %v192_v12 = vperm.slane %v390_v46, 0 }
  0x21   :  { %v181_v52 = vsub.f32 %v180_v47, %v390_v46 }
  0x23   :  { %v184_v59 = vperm.slane %v181_v52, 1  ;;  %v183_v62 = vperm.slane %v181_v52, 0 }
  0x24   :  { %95 = vadd.xlane.f32.xlu1 %v94_v14  ;;  %89 = vadd.xlane.f32.xlu0 %v88_v15 }
  0x8f   :  { %v93_v17 = vpop.xlane.xlu1 %92  ;;  %v87_v18 = vpop.xlane.xlu0 %86 }
  0x90   :  { %v250_v19 = vclamps-f32 %v93_v17, 1.0  ;;  %v248_v20 = vclamps-f32 %v87_v18, 1.0 }
  0x92   :  { %v107_v21 = vadd.f32 1.0, %v250_v19  ;;  %v105_v22 = vadd.f32 1.0, %v248_v20 }
  0x94   :  { %v111_v23 = vadd.f32 1e-05, %v107_v21  ;;  %v109_v24 = vadd.f32 1e-05, %v105_v22 }
  0x96   :  { %v115_v25 = vmul.f32 0.5, %v111_v23  ;;  %v380_v26 = vmul.f32 0.5, %v109_v24 }
  0x97   :  { %v96_v27 = vpop.xlane.xlu1 %95  ;;  %v90_v28 = vpop.xlane.xlu0 %89 }
  0x98   :  { %269 = vrsqrt.f32 %v115_v25  ;;  %v251_v29 = vclamps-f32 %v96_v27, 1.0  ;;  %v249_v30 = vclamps-f32 %v90_v28, 1.0  ;;  %vm148_vm5 = vcmp.eq.f32.partialorder %v115_v25, inf }
  0x99   :  { %271 = vrsqrt.f32 %v380_v26  ;;  %vm124_vm6 = vcmp.eq.f32.partialorder %v380_v26, inf  ;;  %v127_v1 = vand.u32 2147483648, %v380_v26  ;;  %v151_v4 = vand.u32 2147483648, %v115_v25 }
  0x9a   :  { %v108_v32 = vadd.f32 1.0, %v251_v29  ;;  %v106_v33 = vadd.f32 1.0, %v249_v30  ;;  %vm126_vm7 = vcmp.eq.f32.partialorder %v380_v26, 0.0  ;;  %vm150_vm8 = vcmp.eq.f32.partialorder %v115_v25, 0.0 }
  0x9c   :  { %v112_v35 = vadd.f32 1e-05, %v108_v32  ;;  %v110_v36 = vadd.f32 1e-05, %v106_v33 }
  0x9e   :  { %v270_v41 = vpop.eup %269  ;;  %v385_v42 = vmul.f32 0.5, %v112_v35  ;;  %v387_v43 = vmul.f32 0.5, %v110_v36  ;;  %v217_v36 = vadd.s32 4294967288, %v374_v2 }
  0x9f   :  { %v272_v44 = vpop.eup %271  ;;  %v142_v45 = vmul.f32 %v270_v41, %v115_v25 }
  0xa0   :  { %273 = vrsqrt.f32 %v385_v42  ;;  %v118_v48 = vmul.f32 %v272_v44, %v380_v26  ;;  %vm136_vm9 = vcmp.eq.f32.partialorder %v387_v43, inf  ;;  %v139_v24 = vand.u32 2147483648, %v387_v43 }
  0xa1   :  { %275 = vrsqrt.f32 %v387_v43  ;;  %v143_v49 = vmul.f32 %v270_v41, %v142_v45  ;;  %vm160_vm10 = vcmp.eq.f32.partialorder %v385_v42, inf  ;;  %vm138_vm11 = vcmp.eq.f32.partialorder %v387_v43, 0.0 }
  0xa2   :  { %v119_v50 = vmul.f32 %v272_v44, %v118_v48  ;;  %vm162_vm12 = vcmp.eq.f32.partialorder %v385_v42, 0.0 }
  0xa3   :  { %v144_v51 = vmul.f32 0.5, %v143_v49 }
  0xa4   :  { %v120_v53 = vmul.f32 0.5, %v119_v50 }
  0xa5   :  { %v145_v54 = vsub.f32 1.5, %v144_v51 }
  0xa6   :  { %v274_v55 = vpop.eup %273  ;;  %v121_v56 = vsub.f32 1.5, %v120_v53 }
  0xa7   :  { %v276_v57 = vpop.eup %275  ;;  %v146_v58 = vmul.f32 %v270_v41, %v145_v54  ;;  %v154_v60 = vmul.f32 %v274_v55, %v385_v42 }
  0xa8   :  { %v122_v61 = vmul.f32 %v272_v44, %v121_v56  ;;  %v130_v63 = vmul.f32 %v276_v57, %v387_v43 }
  0xa9   :  { %v147_v0 = vmul.f32 %v146_v58, %v115_v25  ;;  %v155_v3 = vmul.f32 %v274_v55, %v154_v60 }
  0xaa   :  { %v123_v5 = vmul.f32 %v122_v61, %v380_v26  ;;  %v131_v6 = vmul.f32 %v276_v57, %v130_v63 }
  0xab   :  { %v149_v7 = vsel %vm148_vm5, %v115_v25, %v147_v0  ;;  %v156_v9 = vmul.f32 0.5, %v155_v3  ;;  %v163_v25 = vand.u32 2147483648, %v385_v42 }
  0xac   :  { %v152_v10 = vsel %vm150_vm8, %v151_v4, %v149_v7  ;;  %v125_v11 = vsel %vm124_vm6, %v380_v26, %v123_v5  ;;  %v132_v13 = vmul.f32 0.5, %v131_v6 }
  0xad   :  { %v189_v14 = vmul.f32 %v184_v59, %v152_v10  ;;  %v128_v15 = vsel %vm126_vm7, %v127_v1, %v125_v11  ;;  %v157_v16 = vsub.f32 1.5, %v156_v9 }
  0xae   :  { %v187_v17 = vmul.f32 %v183_v62, %v128_v15  ;;  %v133_v18 = vsub.f32 1.5, %v132_v13 }
  0xaf   :  { %v198_v19 = vadd.f32 %v193_v8, %v189_v14  ;;  %v158_v20 = vmul.f32 %v274_v55, %v157_v16 }
  0xb0   :  { %v196_v21 = vadd.f32 %v192_v12, %v187_v17  ;;  %v134_v22 = vmul.f32 %v276_v57, %v133_v18 }
  0xb1   :  { %211 = vperm.xlu0 %267, %v198_v19   ;;  %v159_v23 = vmul.f32 %v158_v20, %v385_v42 }
  0xb2   :  { %205 = vperm.xlu2 %266, %v196_v21   ;;  %v135_v26 = vmul.f32 %v134_v22, %v387_v43 }
  0xb3   :  { %v161_v27 = vsel %vm160_vm10, %v385_v42, %v159_v23 }
  0xb4   :  { %v164_v28 = vsel %vm162_vm12, %v163_v25, %v161_v27  ;;  %v137_v29 = vsel %vm136_vm9, %v387_v43, %v135_v26 }
  0xb5   :  { %v190_v30 = vmul.f32 %v184_v59, %v164_v28  ;;  %v140_v31 = vsel %vm138_vm11, %v139_v24, %v137_v29 }
  0xb6   :  { %v188_v32 = vmul.f32 %v183_v62, %v140_v31 }
  0xb7   :  { %v199_v33 = vadd.f32 %v193_v8, %v190_v30 }
  0xb8   :  { %v197_v34 = vadd.f32 %v192_v12, %v188_v32 }
  0xb9   :  { %214 = vperm.xlu1 %268, %v199_v33  }
  0xba   :  { %208 = vperm.xlu2 %266, %v197_v34  }
 0x10c   :  { %v206_v35 = vpop.permute.xlu2 %205 }
 0x10d   :  { %v216_v41 = vperm.slane %v206_v35, %v374_v2 }
 0x114   :  { %v209_v37 = vpop.permute.xlu2 %208 }
 0x115   :  { %v218_v39 = vperm.slane %v209_v37, %v217_v36 }
 0x117   :  { %v220_v44 = vsel %vm219_vm13, %v218_v39, %v216_v41 }
 0x123   :  { %v212_v38 = vpop.permute.xlu0 %211 }
 0x124   :  { %v221_v42 = vperm.slane %v212_v38, %v374_v2 }
 0x12b   :  { %v215_v40 = vpop.permute.xlu1 %214 }
 0x12c   :  { %v222_v43 = vperm.slane %v215_v40, %v217_v36 }
 0x12e   :  { %v223_v45 = vsel %vm219_vm13, %v222_v43, %v221_v42 }
 0x12f   :  { %v225_v46 = vsel %vm224_vm14, %v223_v45, %v220_v44 }
 0x130   :  { %228 = vst.msk [vmem:[#allocation8] sm:$0x3] %vm227_vm15, %v225_v46 }
 0x131   :  { %239 = dma.vmem_to_hbm [thread:$0]  %s235_s10, 32, %s237_s13, [#allocation7]  }
 0x132   :  { %329 = dma.done.wait [#allocation7], 32  }
 0x133   :  { %330 = vsyncadd [#allocation7], 4294967264 }
 0x134   :  { %244 = vsyncpa [#allocation6], 1 }
 0x135   :  { %245 = vsyncpa [#allocation7], 1 }

</bundles_post_ra>
